<compile_context>
chip_gen: v5e
topology: v5e:2x2
jax: 0.10.0
libtpu: 0.0.40
codegen_flags: <defaults>
</compile_context>

<pallas_src>
import numpy as np
import jax
import jax.numpy as jnp
from jax import lax
from jax.experimental import pallas as pl
from jax.experimental.pallas import tpu as pltpu


def _length_regulator_kernel(t_blk_lo_ref, t_blk_hi_ref,
                             cs_excl_ref, cs_incl_ref, x_ref, out_ref):
    # t_blk_lo_ref / t_blk_hi_ref : (B, nL) int32 in SMEM (scalar prefetch)
    # cs_excl_ref : (1, 1, tT) int32  exclusive prefix sum (this T window)
    # cs_incl_ref : (1, 1, tT) int32  inclusive prefix sum (this T window)
    # x_ref       : (1, tT, Dp)       encoder outputs for this T window
    # out_ref     : (1, tL, Dp)       one L-tile of the expanded output
    l = pl.program_id(0)
    b = pl.program_id(1)
    k = pl.program_id(2)
    tL = out_ref.shape[1]
    tT = x_ref.shape[1]

    # Output block is resident across the (arbitrary) T-window axis: zero it
    # once, accumulate disjoint one-hot contributions (exact in any dtype).
    @pl.when(k == 0)
    def _init():
        out_ref[...] = jnp.zeros_like(out_ref)

    lo = t_blk_lo_ref[b, l]
    hi = t_blk_hi_ref[b, l]

    @pl.when(jnp.logical_and(k >= lo, k < hi))
    def _compute():
        row0 = l * tL                                   # global first row of tile
        # Local row iota; shift the T-length cumsums by row0 instead of the
        # (tL, tT) iota (cheaper on the VPU).
        j = lax.broadcasted_iota(jnp.int32, (tL, tT), 0)          # (tL, tT)
        lo_cs = cs_excl_ref[0] - row0                             # (1, tT)
        hi_cs = cs_incl_ref[0] - row0                             # (1, tT)

        # Expansion matrix: M[j, t] = 1  iff  cs_excl[t] <= row0+j < cs_incl[t]
        # Rows past the total length stay all-zero -> zero padding for free.
        mask = jnp.logical_and(j >= lo_cs, j < hi_cs)             # (tL, tT)
        m = mask.astype(x_ref.dtype)                              # exact 0/1

        # Expand on the MXU: out[j, :] = x[index(j), :]
        part = jnp.dot(m, x_ref[0], preferred_element_type=jnp.float32)
        out_ref[0] = out_ref[0] + part.astype(out_ref.dtype)


def length_regulator(x, duration, max_len):
    """x: [B, T, D] float, duration: [B, T] int (>=0), max_len: static int."""
    B, T, D = x.shape
    # TODO(synk): torch accepts a runtime max_len; here it must be a static
    # Python int (it defines the output shape / grid).
    L = int(max_len)

    dur = duration.astype(jnp.int32)
    # TODO(synk): torch returns LongTensor (int64); JAX default is x32.
    mel_len = jnp.sum(dur, axis=-1).astype(jnp.int32)             # (B,)

    # ---- L tiling: always tiled, ragged last block handled by cdiv grid ----
    if L >= 512:
        tL = 512
    elif L >= 256:
        tL = 256
    elif L >= 128:
        tL = 128
    else:
        tL = max(8, ((L + 7) // 8) * 8)      # tiny L: one sublane-aligned tile
    nL = pl.cdiv(L, tL)

    # ---- T windowing: single full-T block when small, 128-wide blocks else --
    if T <= 256:
        tT = T
        T_pad = T
    else:
        tT = 128
        T_pad = ((T + tT - 1) // tT) * tT
    nT = max(1, T_pad // tT)

    if T_pad != T:
        # Pad durations with zeros (cumsum stays flat -> padded phonemes
        # contribute nothing) and x with zero rows.
        dur_p = jnp.pad(dur, ((0, 0), (0, T_pad - T)))
        x_p = jnp.pad(x, ((0, 0), (0, T_pad - T), (0, 0)))
    else:
        dur_p, x_p = dur, x

    # ---- D lane padding: keep the output slab lane-dense (multiple of 128) --
    if D % 128 != 0:
        D_pad = ((D + 127) // 128) * 128
        x_p = jnp.pad(x_p, ((0, 0), (0, 0), (0, D_pad - D)))
    else:
        D_pad = D

    # ---- cheap length-T prep in the wrapper ----
    cs_incl = jnp.cumsum(dur_p, axis=-1, dtype=jnp.int32)         # (B, T_pad)
    cs_excl = cs_incl - dur_p                                     # (B, T_pad)

    # Per-(b, l) active phoneme-block window (scalar prefetch).  A phoneme t
    # can touch output rows [row0, row0+tL) only if
    #   cs_incl[t] > row0  and  cs_excl[t] < row0 + tL.
    row0 = jnp.arange(nL, dtype=jnp.int32) * tL                   # (nL,)
    t_start = jnp.sum(cs_incl[:, None, :] <= row0[None, :, None],
                      axis=-1).astype(jnp.int32)                  # (B, nL)
    t_end = jnp.sum(cs_excl[:, None, :] < (row0[None, :, None] + tL),
                    axis=-1).astype(jnp.int32)                    # (B, nL)
    empty = t_start >= t_end
    t_blk_lo = jnp.where(empty, 0, t_start // tT).astype(jnp.int32)
    t_blk_hi = jnp.where(empty, 0, (t_end + tT - 1) // tT).astype(jnp.int32)

    # Clamp the walked T-block index into the active window so inactive steps
    # revisit the same block (DMA de-dup) and never index out of bounds.
    def _t_block(l, b, k, lo_ref, hi_ref):
        lo = lo_ref[b, l]
        hi = hi_ref[b, l]
        return jnp.minimum(jnp.maximum(k, lo), jnp.maximum(hi - 1, lo))

    grid_spec = pltpu.PrefetchScalarGridSpec(
        num_scalar_prefetch=2,
        grid=(nL, B, nT),   # L-tiles leading -> shards across v7x's 2 TCs at B==1
        in_specs=[
            pl.BlockSpec((1, 1, tT),
                         lambda l, b, k, lo, hi: (b, 0, _t_block(l, b, k, lo, hi))),
            pl.BlockSpec((1, 1, tT),
                         lambda l, b, k, lo, hi: (b, 0, _t_block(l, b, k, lo, hi))),
            pl.BlockSpec((1, tT, D_pad),
                         lambda l, b, k, lo, hi: (b, _t_block(l, b, k, lo, hi), 0)),
        ],
        out_specs=pl.BlockSpec((1, tL, D_pad), lambda l, b, k, lo, hi: (b, l, 0)),
    )

    itemsize = jnp.dtype(x.dtype).itemsize
    # Actual working set: out + x double buffers, cumsum buffers, mask temps.
    vmem_need = (2 * tL * D_pad * itemsize
                 + 2 * tT * D_pad * itemsize
                 + 4 * tT * 4
                 + 4 * tL * tT * 4)
    vmem_limit = int(min(max(4 * vmem_need, 8 * 1024 * 1024), 32 * 1024 * 1024))

    cost = pl.CostEstimate(
        flops=2 * B * nL * tL * T_pad * D_pad,
        transcendentals=0,
        bytes_accessed=(B * T_pad * D_pad * itemsize        # x
                        + B * L * D_pad * itemsize          # out
                        + 2 * B * T_pad * 4                 # cumsums
                        + 2 * B * nL * 4),                  # prefetch scalars
    )

    out = pl.pallas_call(
        _length_regulator_kernel,
        out_shape=jax.ShapeDtypeStruct((B, L, D_pad), x.dtype),
        grid_spec=grid_spec,
        compiler_params=pltpu.CompilerParams(
            dimension_semantics=("parallel", "parallel", "arbitrary"),
            vmem_limit_bytes=vmem_limit,
        ),
        cost_estimate=cost,
    )(t_blk_lo, t_blk_hi,
      cs_excl.reshape(B, 1, T_pad), cs_incl.reshape(B, 1, T_pad), x_p)

    if D_pad != D:
        out = out[:, :, :D]
    return out, mel_len


def _reference_length_regulator(x, dur, max_len):
    x = np.asarray(x, dtype=np.float32)
    dur = np.asarray(dur)
    B, T, D = x.shape
    out = np.zeros((B, max_len, D), dtype=np.float32)
    mel = np.zeros((B,), dtype=np.int32)
    for b in range(B):
        pos = 0
        for t in range(T):
            for _ in range(int(dur[b, t])):
                if pos < max_len:
                    out[b, pos] = x[b, t]
                pos += 1
        mel[b] = int(dur[b].sum())
    return out, mel


def _run_case(key, B, T, D, max_len, dtype, max_dur):
    kx, kd = jax.random.split(key)
    x = jax.random.normal(kx, (B, T, D), dtype=jnp.float32).astype(dtype)
    duration = jax.random.randint(kd, (B, T), minval=0, maxval=max_dur,
                                  dtype=jnp.int32)

    out, mel_len = length_regulator(x, duration, max_len)
    out = jax.block_until_ready(out)
    mel_len = jax.block_until_ready(mel_len)

    ref_out, ref_mel = _reference_length_regulator(
        np.asarray(x).astype(np.float32), duration, max_len)
    assert out.shape == (B, max_len, D)
    assert mel_len.shape == (B,)
    np.testing.assert_allclose(np.asarray(out).astype(np.float32), ref_out,
                               rtol=1e-6, atol=1e-6)
    np.testing.assert_array_equal(np.asarray(mel_len), ref_mel)


if __name__ == "__main__":
    key = jax.random.PRNGKey(0)
    k1, k2, k3 = jax.random.split(key, 3)

    # Small case: f32, D=32 (exercises D->128 lane padding), single L tile.
    _run_case(k1, B=2, T=8, D=32, max_len=32, dtype=jnp.float32, max_dur=4)

    # bf16 MXU path, lane-dense D=128, L=256 (one 256-row tile), durations
    # that can overflow max_len to exercise truncation.
    _run_case(k2, B=2, T=16, D=128, max_len=256, dtype=jnp.bfloat16, max_dur=32)

    # Large-T path: T=300 > 256 triggers T-windowing (tT=128, padded T),
    # ragged L tiling (L=640 with tL=512 -> masked last block), zero-padding
    # of the output tail, at B=1 (L-leading grid still shards on v7x).
    _run_case(k3, B=1, T=300, D=128, max_len=640, dtype=jnp.bfloat16, max_dur=4)

    print("KERNEL_OK")
</pallas_src>

<mosaic_0001>
module attributes {stable_mosaic.version = 11 : i64} {
  func.func @_length_regulator_kernel(%arg0: i32, %arg1: i32, %arg2: i32, %arg3: memref<2x1xi32, #tpu.memory_space<smem>>, %arg4: memref<2x1xi32, #tpu.memory_space<smem>>, %arg5: memref<1x1x8xi32, #tpu.memory_space<vmem>>, %arg6: memref<1x1x8xi32, #tpu.memory_space<vmem>>, %arg7: memref<1x8x128xf32, #tpu.memory_space<vmem>>, %arg8: memref<1x32x128xf32, #tpu.memory_space<vmem>>) attributes {dimension_semantics = [#tpu.dimension_semantics<parallel>, #tpu.dimension_semantics<parallel>, #tpu.dimension_semantics<arbitrary>], iteration_bounds = array<i64: 1, 2, 1>, scalar_prefetch = 2 : i64, scratch_operands = 0 : i64, tpu.core_type = #tpu.core_type<tc>, window_params = [{transform_indices = @transform_0, window_bounds = array<i64: 1, 1, 8>}, {transform_indices = @transform_1, window_bounds = array<i64: 1, 1, 8>}, {transform_indices = @transform_2, window_bounds = array<i64: 1, 8, 128>}, {transform_indices = @transform_3, window_bounds = array<i64: 1, 32, 128>}]} {
    %c0_i32 = arith.constant 0 : i32
    %0 = arith.cmpi eq, %arg2, %c0_i32 : i32
    %1 = arith.extui %0 : i1 to i32
    %c0_i32_0 = arith.constant 0 : i32
    %2 = arith.cmpi ne, %1, %c0_i32_0 : i32
    scf.if %2 {
      %cst = arith.constant 0.000000e+00 : f32
      %14 = vector.broadcast %cst : f32 to vector<1x32x128xf32>
      %c0 = arith.constant 0 : index
      %c0_2 = arith.constant 0 : index
      %c0_3 = arith.constant 0 : index
      %15 = vector.load %arg8[%c0, %c0_2, %c0_3] : memref<1x32x128xf32, #tpu.memory_space<vmem>>, vector<1x32x128xf32>
      tpu.vector_store %arg8[%c0, %c0_2, %c0_3], %14 {strides = array<i32>} : memref<1x32x128xf32, #tpu.memory_space<vmem>>, vector<1x32x128xf32>,
    } else {
    }
    %3 = arith.index_cast %arg1 : i32 to index
    %4 = arith.index_cast %arg0 : i32 to index
    %5 = memref.load %arg3[%3, %4] : memref<2x1xi32, #tpu.memory_space<smem>>
    %6 = arith.index_cast %arg1 : i32 to index
    %7 = arith.index_cast %arg0 : i32 to index
    %8 = memref.load %arg4[%6, %7] : memref<2x1xi32, #tpu.memory_space<smem>>
    %9 = arith.cmpi sge, %arg2, %5 : i32
    %10 = arith.cmpi slt, %arg2, %8 : i32
    %11 = arith.andi %9, %10 : i1
    %12 = arith.extui %11 : i1 to i32
    %c0_i32_1 = arith.constant 0 : i32
    %13 = arith.cmpi ne, %12, %c0_i32_1 : i32
    scf.if %13 {
      %c32_i32 = arith.constant 32 : i32
      %14 = arith.muli %arg0, %c32_i32 : i32
      %15 = tpu.iota {dimensions = array<i32: 0>} : vector<32x8xi32>
      %c0 = arith.constant 0 : index
      %c0_2 = arith.constant 0 : index
      %c0_3 = arith.constant 0 : index
      %16 = vector.load %arg5[%c0, %c0_2, %c0_3] : memref<1x1x8xi32, #tpu.memory_space<vmem>>, vector<1x1x8xi32>
      %17 = vector.shape_cast %16 : vector<1x1x8xi32> to vector<1x8xi32>
      %18 = vector.broadcast %14 : i32 to vector<1x8xi32>
      %19 = arith.subi %17, %18 : vector<1x8xi32>
      %c0_4 = arith.constant 0 : index
      %c0_5 = arith.constant 0 : index
      %c0_6 = arith.constant 0 : index
      %20 = vector.load %arg6[%c0_4, %c0_5, %c0_6] : memref<1x1x8xi32, #tpu.memory_space<vmem>>, vector<1x1x8xi32>
      %21 = vector.shape_cast %20 : vector<1x1x8xi32> to vector<1x8xi32>
      %22 = vector.broadcast %14 : i32 to vector<1x8xi32>
      %23 = arith.subi %21, %22 : vector<1x8xi32>
      %24 = vector.broadcast %19 : vector<1x8xi32> to vector<32x8xi32>
      %25 = arith.cmpi sge, %15, %24 : vector<32x8xi32>
      %26 = vector.broadcast %23 : vector<1x8xi32> to vector<32x8xi32>
      %27 = arith.cmpi slt, %15, %26 : vector<32x8xi32>
      %28 = arith.andi %25, %27 : vector<32x8xi1>
      %29 = arith.extui %28 : vector<32x8xi1> to vector<32x8xi32>
      %30 = arith.sitofp %29 : vector<32x8xi32> to vector<32x8xf32>
      %c0_7 = arith.constant 0 : index
      %c0_8 = arith.constant 0 : index
      %c0_9 = arith.constant 0 : index
      %31 = vector.load %arg7[%c0_7, %c0_8, %c0_9] : memref<1x8x128xf32, #tpu.memory_space<vmem>>, vector<1x8x128xf32>
      %32 = vector.shape_cast %31 : vector<1x8x128xf32> to vector<8x128xf32>
      %cst = arith.constant dense<0.000000e+00> : vector<32x128xf32>
      %33 = tpu.matmul %30, %32, %cst {dimension_numbers = #tpu.dot_dimension_numbers<[1], [0], [0], [1], [0, 0, 1, 1], [], []>} : vector<32x8xf32>, vector<8x128xf32>, vector<32x128xf32> -> vector<32x128xf32>
      %c0_10 = arith.constant 0 : index
      %c0_11 = arith.constant 0 : index
      %c0_12 = arith.constant 0 : index
      %34 = vector.load %arg8[%c0_10, %c0_11, %c0_12] : memref<1x32x128xf32, #tpu.memory_space<vmem>>, vector<1x32x128xf32>
      %35 = vector.shape_cast %34 : vector<1x32x128xf32> to vector<32x128xf32>
      %36 = arith.addf %35, %33 : vector<32x128xf32>
      %c0_13 = arith.constant 0 : index
      %c0_14 = arith.constant 0 : index
      %c0_15 = arith.constant 0 : index
      %37 = vector.load %arg8[%c0_13, %c0_14, %c0_15] : memref<1x32x128xf32, #tpu.memory_space<vmem>>, vector<1x32x128xf32>
      %38 = vector.shape_cast %37 : vector<1x32x128xf32> to vector<32x128xf32>
      %39 = vector.shape_cast %36 : vector<32x128xf32> to vector<1x32x128xf32>
      tpu.vector_store %arg8[%c0_13, %c0_14, %c0_15], %39 {strides = array<i32>} : memref<1x32x128xf32, #tpu.memory_space<vmem>>, vector<1x32x128xf32>,
    } else {
    }
    return
  }
  func.func @transform_0(%arg0: i32, %arg1: i32, %arg2: i32, %arg3: memref<2x1xi32, #tpu.memory_space<smem>>, %arg4: memref<2x1xi32, #tpu.memory_space<smem>>) -> (i32, i32, i32) {
    %0 = arith.index_cast %arg1 : i32 to index
    %1 = arith.index_cast %arg0 : i32 to index
    %2 = memref.load %arg3[%0, %1] : memref<2x1xi32, #tpu.memory_space<smem>>
    %3 = arith.index_cast %arg1 : i32 to index
    %4 = arith.index_cast %arg0 : i32 to index
    %5 = memref.load %arg4[%3, %4] : memref<2x1xi32, #tpu.memory_space<smem>>
    %6 = arith.maxsi %arg2, %2 : i32
    %c1_i32 = arith.constant 1 : i32
    %7 = arith.subi %5, %c1_i32 : i32
    %8 = arith.maxsi %7, %2 : i32
    %9 = arith.minsi %6, %8 : i32
    %c0_i32 = arith.constant 0 : i32
    %c0_i32_0 = arith.constant 0 : i32
    return %arg1, %c0_i32, %9 : i32, i32, i32
  }
  func.func @transform_1(%arg0: i32, %arg1: i32, %arg2: i32, %arg3: memref<2x1xi32, #tpu.memory_space<smem>>, %arg4: memref<2x1xi32, #tpu.memory_space<smem>>) -> (i32, i32, i32) {
    %0 = arith.index_cast %arg1 : i32 to index
    %1 = arith.index_cast %arg0 : i32 to index
    %2 = memref.load %arg3[%0, %1] : memref<2x1xi32, #tpu.memory_space<smem>>
    %3 = arith.index_cast %arg1 : i32 to index
    %4 = arith.index_cast %arg0 : i32 to index
    %5 = memref.load %arg4[%3, %4] : memref<2x1xi32, #tpu.memory_space<smem>>
    %6 = arith.maxsi %arg2, %2 : i32
    %c1_i32 = arith.constant 1 : i32
    %7 = arith.subi %5, %c1_i32 : i32
    %8 = arith.maxsi %7, %2 : i32
    %9 = arith.minsi %6, %8 : i32
    %c0_i32 = arith.constant 0 : i32
    %c0_i32_0 = arith.constant 0 : i32
    return %arg1, %c0_i32, %9 : i32, i32, i32
  }
  func.func @transform_2(%arg0: i32, %arg1: i32, %arg2: i32, %arg3: memref<2x1xi32, #tpu.memory_space<smem>>, %arg4: memref<2x1xi32, #tpu.memory_space<smem>>) -> (i32, i32, i32) {
    %0 = arith.index_cast %arg1 : i32 to index
    %1 = arith.index_cast %arg0 : i32 to index
    %2 = memref.load %arg3[%0, %1] : memref<2x1xi32, #tpu.memory_space<smem>>
    %3 = arith.index_cast %arg1 : i32 to index
    %4 = arith.index_cast %arg0 : i32 to index
    %5 = memref.load %arg4[%3, %4] : memref<2x1xi32, #tpu.memory_space<smem>>
    %6 = arith.maxsi %arg2, %2 : i32
    %c1_i32 = arith.constant 1 : i32
    %7 = arith.subi %5, %c1_i32 : i32
    %8 = arith.maxsi %7, %2 : i32
    %9 = arith.minsi %6, %8 : i32
    %c0_i32 = arith.constant 0 : i32
    %c0_i32_0 = arith.constant 0 : i32
    return %arg1, %9, %c0_i32 : i32, i32, i32
  }
  func.func @transform_3(%arg0: i32, %arg1: i32, %arg2: i32, %arg3: memref<2x1xi32, #tpu.memory_space<smem>>, %arg4: memref<2x1xi32, #tpu.memory_space<smem>>) -> (i32, i32, i32) {
    %c0_i32 = arith.constant 0 : i32
    %c0_i32_0 = arith.constant 0 : i32
    return %arg1, %arg0, %c0_i32 : i32, i32, i32
  }
}

</mosaic_0001>

<bundles_post_ra>
// kernel: tpu_custom_call.1
= control target key start
LH: loop header
LB: loop body
LE: loop exit
PB: predicated region body
PF: predicated region fallthrough
CT: control target
= control target key end

     0   :  { %s1129_s24 = smov [#allocation3]   ;;  %s1130_s25 = smov [#allocation4]   ;;  %s1398_s0 = inlined_call_operand.vmem [shape: s32[2,1], index: 0, kind: input, shape index: {}]   ;;  %s1399_s2 = inlined_call_operand.vmem [shape: s32[2,1,8], index: 2, kind: input, shape index: {}]   ;;  %s1400_s3 = inlined_call_operand.vmem [shape: s32[2,1,8], index: 3, kind: input, shape index: {}]   ;;  %s1401_s4 = inlined_call_operand.hbm [shape: f32[2,8,128], index: 4, kind: input, shape index: {}]   ;;  %s1402_s5 = inlined_call_operand.hbm [shape: f32[2,32,128], index: 5, kind: output, shape index: {}]   ;;  %s1403_s1 = inlined_call_operand.vmem [shape: s32[2,1], index: 1, kind: input, shape index: {}]  }
   0x1   :  { %s11_s20 = sshll.u32 %s1398_s0, 4  ;;  %s16_s23 = sshll.u32 %s1403_s1, 4  ;;  %s12_s20 = int_to_ptr.vmem [resolvable:$true] %s11_s20  ;;  %s17_s23 = int_to_ptr.vmem [resolvable:$true] %s16_s23 }
   0x2   :  { %14 = dma.vmem_to_smem %s12_s20, 32, %s1129_s24, [#allocation2] }
   0x3   :  { %19 = dma.vmem_to_smem %s17_s23, 32, %s1130_s25, [#allocation2] }
   0x4   :  { %1083 = dma.done.wait [#allocation2], 64 }
   0x5   :  { %1084 = vsyncadd [#allocation2], 4294967232 }
   0x6   :  { %22 = sfence }
   0x7   :  { %23 = vsyncpa [#allocation6], 0 }
   0x8   :  { %25 = vsyncpa [#allocation6 + $0x1], 0 }
   0x9   :  { %26 = vsyncpa [#allocation7], 0 }
   0xa   :  { %28 = vsyncpa [#allocation7 + $0x1], 0  ;;  %s1171_s26 = smov 0   ;;  %s1173_s0 = smov 0  }
   0xb   :  { %s1175_s27 = smov 0   ;;  %s1177_s1 = smov 0  }
   0xc   :  { %s1179_s28 = smov 0   ;;  %s1181_s29 = smov 0  }
   0xd   :  { %s1183_s30 = smov 0   ;;  %s1185_s6 = smov 0  }
   0xe   :  { %s1187_s7 = smov 0  }
   0xf LB: > { %1407 = sst [smem:[#allocation16_spill]] %s1103_s27  ;;  %s807_s8 = sadd.s32 4294967295, %s1127_s7   ;;  %s1127_s7 = sphi %s1187_s7, %s34_s7   ;;  %s1123_s6 = sphi %s1185_s6, %s1427_s6   ;;  %s1119_s30 = sphi %s1183_s30, %s1426_s30   ;;  %s1115_s29 = sphi %s1181_s29, %s1420_s29   ;;  %s1111_s28 = sphi %s1179_s28, %s1425_s28   ;;  %s1107_s1 = sphi %s1177_s1, %s1424_s1   ;;  %s1103_s27 = sphi %s1175_s27, %s1418_s27   ;;  %s1099_s0 = sphi %s1173_s0, %s1423_s0   ;;  %s1095_s26 = sphi %s1171_s26, %s1422_s26  }
  0x10   : > { %1408 = sst [smem:[#allocation17_spill]] %s1115_s29  ;;  %s49_s9 = sadd.s32 1, %s1123_s6 }
  0x11   : > { %s1219_s10 = sshll.u32 %s1123_s6, 7  ;;  %p51_p0 = scmp.ge.s32.totalorder %s49_s9, 2 }
  0x12   : > { %s184_s11 = sld [smem:[#allocation3 + %s1219_s10]]  ;;  %s808_s12 = sadd.s32 4294967294, %s1127_s7  }
  0x13   : > { %s185_s13 = sld [smem:[#allocation4 + %s1219_s10]]  ;;  %s1429_s9 = smov (%p51_p0, %s49_s9), 0 }
  0x14   : > { %1409 = sst [smem:[#allocation18_spill]] %s1429_s9  ;;  %s214_s14 = sadd.s32 1, %s1115_s29 }
  0x15   : > { %p221_p1 = scmp.ne.s32.totalorder %s1115_s29, %s1111_s28  ;;  %s824_s15 = sshll.u32 %s1429_s9, 7 }
  0x16   : > { %p222_p2 = scmp.eq.s32.totalorder %s1127_s7, 0  ;;  %s200_s16 = sld [smem:[#allocation3 + %s824_s15]] }
  0x17   : > { %s209_s17 = ssub.s32 %s1123_s6, %s1429_s9  ;;  %s201_s18 = sld [smem:[#allocation4 + %s824_s15]] }
  0x18   : > { %p822_p3 = scmp.lt.s32.totalorder %s184_s11, 0  ;;  %p227_p4 = scmp.ne.s32.totalorder %s1111_s28, %s1107_s1 }
  0x19   : > { %s823_s19 = sadd.s32 4294967295, %s185_s13  ;;  %p228_p6 = scmp.eq.s32.totalorder %s807_s8, 0 }
  0x1a   : > { %s187_s20 = scalar_select %p822_p3, 0, %s184_s11 }
  0x1b   : > { %p189_p5 = scmp.gt.s32.totalorder %s823_s19, %s184_s11  ;;  %p240_p7 = scmp.eq.s32.totalorder %s209_s17, 0 }
  0x1c   : > { %s242_s21 = sadd.s32 1, %s1103_s27  ;;  %p825_p8 = scmp.lt.s32.totalorder %s200_s16, 0 }
  0x1d   : > { %s1431_s19 = smov (!%p189_p5, %s823_s19), %s184_s11  ;;  %s826_s22 = sadd.s32 4294967295, %s201_s18 }
  0x1e   : > { %p191_p9 = scmp.lt.s32.totalorder %s187_s20, %s1431_s19  ;;  %p205_p10 = scmp.gt.s32.totalorder %s826_s22, %s200_s16 }
  0x1f   : > { %s203_s23 = scalar_select %p825_p8, 0, %s200_s16 }
  0x20   : > { %s1433_s20 = smov (!%p191_p9, %s187_s20), %s1431_s19  ;;  %s1435_s22 = smov (!%p205_p10, %s826_s22), %s200_s16 }
  0x21   : > { %p1241_p11 = por %p228_p6, %p227_p4  ;;  %p252_p12 = scmp.ne.s32.totalorder %s1103_s27, %s1099_s0 }
  0x22   : > { %p207_p13 = scmp.lt.s32.totalorder %s203_s23, %s1435_s22  ;;  %p253_p0 = scmp.eq.s32.totalorder %s807_s8, 1 }
  0x23   : > { %s1251_s25 = scalar_select %p240_p7, %s1103_s27, %s242_s21  }
  0x24   : > { %s1437_s23 = smov (!%p207_p13, %s203_s23), %s1435_s22  ;;  %p1253_p3 = por %p253_p0, %p252_p12 }
  0x25   : > { %1411 = sst [smem:[#allocation19_spill]] %s1251_s25  ;;  %p258_p5 = scmp.ne.s32.totalorder %s1099_s0, %s1095_s26 }
  0x26   : > { %s210_s1 = ssub.s32 %s1433_s20, %s1437_s23  ;;  %p259_p4 = scmp.eq.s32.totalorder %s808_s12, 1 }
  0x27   : > { %s211_s13 = sor.u32 %s210_s1, %s209_s17  ;;  %p828_p6 = scmp.ge.s32.totalorder %s1127_s7, 2 }
  0x28   : > { %p212_p8 = scmp.eq.s32.totalorder %s211_s13, 0  ;;  %p1262_p9 = por %p259_p4, %p258_p5 }
  0x29   : > { %p223_p7 = por %p222_p2, %p221_p1  ;;  %p883_p10 = scmp.lt.s32.totalorder %s1127_s7, 2 }
  0x2a   : > { %s1275_s15 = scalar_select %p212_p8, %s1115_s29, %s214_s14  }
  0x2b   : > { %p1277_p12 = pnand %p883_p10, %p223_p7  ;;  %s1439_s10 = smov (!%p223_p7, %s1219_s10), 0 }
  0x2c   : > { %1414 = sst [smem:[#allocation20_spill]] %s1275_s15  ;;  %s1443_s10 = smov (!%p883_p10, %s1439_s10), 0 }
  0x2d   : > { %s863_s12 = scalar_select %p223_p7, [#allocation3], [#allocation9] }
  0x2e   : > { %s865_s17 = scalar_select %p223_p7, [#allocation4], [#allocation10] }
  0x2f   : > { %s1441_s12 = smov (!%p883_p10, %s863_s12), [#allocation11]  ;;  %p834_p13 = scmp.ge.s32.totalorder %s1127_s7, 1 }
  0x30   : > { %s373_s18 = sld [smem:[%s1441_s12 + %s1443_s10]]  ;;  %s1445_s17 = smov (!%p883_p10, %s865_s17), [#allocation12] }
  0x31   : > { %s374_s19 = sld [smem:[%s1445_s17 + %s1443_s10]]  ;;  %p395_p1 = scmp.lt.s32.totalorder %s1127_s7, 3 }
  0x32   : > { %s361_s14 = sand.u32 1, %s1115_s29   ;;  %p993_p7 = pneg %p1277_p12 }
  0x33   : > { %p1284_p0 = pnand %p834_p13, %p395_p1  ;;  %s829_s23 = sshll.u32 %s361_s14, 3 }
  0x34   : > { %s365_s1 = scalar_lea.vmem [#allocation5], %s829_s23  ;;  %s362_s29 = scalar_lea.sflag [#allocation6], %s361_s14 }
  0x35   : > { %s390_s13 = sshll.u32 %s365_s1, 4  ;;  %s391_s13 = int_to_ptr.vmem [resolvable:$true] %s390_s13 }
  0x36   : > { %p831_p2 = scmp.lt.s32.totalorder %s373_s18, 0 }
  0x37   : > { %s832_s22 = sadd.s32 4294967295, %s374_s19 }
  0x38   : > { %s376_s21 = scalar_select %p831_p2, 0, %s373_s18 }
  0x39   : > { %p378_p5 = scmp.gt.s32.totalorder %s832_s22, %s373_s18 }
  0x3b   : > { %s1447_s22 = smov (!%p378_p5, %s832_s22), %s373_s18 }
  0x3c   : > { %p380_p4 = scmp.lt.s32.totalorder %s376_s21, %s1447_s22 }
  0x3e   : > { %s1449_s21 = smov (!%p380_p4, %s376_s21), %s1447_s22 }
  0x3f   : > { %s384_s12 = sadd.s32 %s1123_s6, %s1449_s21  ;;  %s996_s21 = scalar_lea.hbm %s1401_s4, 16 }
  0x40   : > { %s833_s10 = sshll.u32 %s384_s12, 3 }
  0x41   : > { %s386_s15 = scalar_lea.hbm %s1401_s4, %s833_s10 }
  0x42   : > { %s388_s25 = sshll.u32 %s386_s15, 4  ;;  %s389_s25 = int_to_ptr.hbm [resolvable:$true] %s388_s25 }
  0x43   : > { %s989_s27 = sshra.s32 %s389_s25, 4  ;;  %s990_s27 = int_to_ptr.hbm [resolvable:$true] %s989_s27 }
  0x44   : > { %s991_s19 = scalar_lea.hbm %s990_s27, 8  ;;  %p997_p1 = scmp.lt.s32.totalorder %s990_s27, %s1401_s4 }
  0x45   : > { %p992_p8 = scmp.ne.s32.totalorder %s990_s27, %s991_s19  ;;  %p998_p2 = scmp.lt.s32.totalorder %s996_s21, %s991_s19 }
  0x47   : > { %p994_p10 = pnand %p993_p7, %p992_p8  ;;  %p999_p5 = por %p998_p2, %p997_p1 }
  0x49   : > { %p995_p13 = pneg %p994_p10 }
  0x4b   : > { %p1000_p4 = pnand %p999_p5, %p995_p13 }
  0x4d   : > { %1003 = shalt.err (!%p1000_p4)
}
  0x4e   : > { %878 = dma.hbm_to_vmem [thread:$0]  (!%p1277_p12), %s389_s25, 128, %s391_s13, %s362_s29  }
  0x4f   : > { %399 = sbr.rel (%p1284_p0) target bundleno = 271 (0x10f), region = 32  ;;  %s401_s9 = sand.u32 (!%p1284_p0), 1, %s1111_s28  }
  0x50   : > { %s1306_s15 = sshll.u32 (!%p1284_p0), %s401_s9, 3  ;;  %s402_s14 = scalar_lea.sflag (!%p1284_p0), [#allocation6], %s401_s9 }
  0x51   : > { %s405_s12 = scalar_lea.vmem (!%p1284_p0), [#allocation5], %s1306_s15 }
  0x54   : > { %1086 = dma.done.wait (%p1241_p11), %s402_s14, 128  }
  0x55   : > { %1088 = vsyncadd (%p1241_p11), %s402_s14, 4294967168  ;;  %s837_s27 = sshll.u32 %s1119_s30, 7  ;;  %p489_p12 = scmp.lt.s32.totalorder %s1119_s30, 1  ;;  %v1131_v0 = vmov 0.0  }
  0x56   : > { %s480_s29 = sld [smem:[#allocation3 + %s837_s27]]  ;;  %s470_s25 = sand.u32 1, %s1099_s0  }
  0x57   : > { %s481_s16 = sld [smem:[#allocation4 + %s837_s27]]  ;;  %s836_s20 = sshll.u32 %s470_s25, 5 }
  0x58   : > { %s1319_s13 = scalar_select %p489_p12, %s1119_s30, 1 }
  0x59   : > { %s518_s10 = sld [smem:[#allocation3 + %s837_s27]]  ;;  %s1321_s19 = scalar_lea.vmem [#allocation8], %s836_s20 }
  0x5a   : > { %s519_s17 = sld [smem:[#allocation4 + %s837_s27]]  ;;  %570 = vst [vmem:[%s1321_s19] sm:$0xff] %v1131_v0 }
  0x5b   : > { %s581_s24 = sld [smem:[#allocation3 + %s837_s27]]  ;;  %571 = vst [vmem:[%s1321_s19 + $0x8] sm:$0xff] %v1131_v0 }
  0x5c   : > { %p838_p11 = scmp.lt.s32.totalorder %s480_s29, 0  ;;  %s582_s18 = sld [smem:[#allocation4 + %s837_s27]]  ;;  %572 = vst [vmem:[%s1321_s19 + $0x10] sm:$0xff] %v1131_v0 }
  0x5d   : > { %s839_s22 = sadd.s32 4294967295, %s481_s16  ;;  %573 = vst [vmem:[%s1321_s19 + $0x18] sm:$0xff] %v1131_v0 }
  0x5e   : > { %s483_s21 = scalar_select %p838_p11, 0, %s480_s29 }
  0x5f   : > { %p485_p0 = scmp.gt.s32.totalorder %s839_s22, %s480_s29  ;;  %p841_p8 = scmp.lt.s32.totalorder %s518_s10, 0 }
  0x60   : > { %s842_s23 = sadd.s32 4294967295, %s519_s17 }
  0x61   : > { %s1451_s22 = smov (!%p485_p0, %s839_s22), %s480_s29  ;;  %p523_p10 = scmp.gt.s32.totalorder %s842_s23, %s518_s10 }
  0x62   : > { %s521_s1 = scalar_select %p841_p8, 0, %s518_s10 }
  0x63   : > { %p487_p7 = scmp.lt.s32.totalorder %s483_s21, %s1451_s22  ;;  %p844_p13 = scmp.le.s32.totalorder %s581_s24, 0 }
  0x64   : > { %p845_p1 = scmp.gt.s32.totalorder %s582_s18, 0  ;;  %s1455_s23 = smov (!%p523_p10, %s842_s23), %s518_s10 }
  0x65   : > { %s1453_s21 = smov (!%p487_p7, %s483_s21), %s1451_s22  ;;  %p525_p4 = scmp.lt.s32.totalorder %s521_s1, %s1455_s23 }
  0x66   : > { %p491_p2 = scmp.lt.s32.totalorder %s1453_s21, 0  ;;  %p585_p5 = pnand %p845_p1, %p844_p13 }
  0x67   : > { %s1459_s1 = smov (!%p525_p4, %s521_s1), %s1455_s23 }
  0x68   : > { %s1457_s21 = smov (!%p491_p2, %s1453_s21), 0  ;;  %p529_p12 = scmp.lt.s32.totalorder %s1459_s1, 0 }
  0x69   : > { %s493_s9 = sadd.s32 %s1457_s21, %s1319_s13  ;;  %588 = sbr.rel (%p585_p5) target bundleno = 255 (0xff), region = 44 }
  0x6a   : > { %s494_s16 = scalar_lea.vmem %s1399_s2, %s493_s9  ;;  %s1461_s1 = smov (!%p529_p12, %s1459_s1), 0 }
  0x6b   : > { %s531_s29 = sadd.s32 %s1461_s1, %s1319_s13 }
  0x6c   : > { %s532_s24 = scalar_lea.vmem %s1400_s3, %s531_s29 }
  0x6e   : > { %v622_v1 = vld [vmem:[%s405_s12] sm:$0xff]  ;;  %v590_v2 = vlaneseq  ;;  %vm623_vm2 = vcmask 64512   ;;  %v1132_v9 = vmov 0.0   ;;  %v665_v14 = vld [vmem:[%s1321_s19] sm:$0xff]  ;;  %v666_v17 = vld [vmem:[%s1321_s19 + $0x8] sm:$0xff] }
  0x6f   : > { %861 = vmatpush.msra.mxu2 %v622_v1  ;;  %862 = vmatpush.msra.mxu3 %v622_v1  ;;  %v963_v4 = vld [vmem:[%s494_s16] ss:$0 sm:$0xff]  ;;  %v668_v21 = vld [vmem:[%s1321_s19 + $0x18] sm:$0xff] }
  0x70   : > { %v591_v3 = vshrl.u32 %v590_v2, 7  ;;  %v964_v5 = vld [vmem:[%s532_s24] ss:$0 sm:$0xff]  ;;  %651 = vmatpush.msra.mxu0 %v622_v1  ;;  %860 = vmatpush.msra.mxu1 %v622_v1 }
  0x71   : > { %v667_v20 = vld [vmem:[%s1321_s19 + $0x10] sm:$0xff] }
  0x72   : > { %v593_v6 = vadd.s32 16, %v591_v3  ;;  %v594_v7 = vadd.s32 24, %v591_v3  ;;  %vm601_vm0 = vcmp.ge.s32.totalorder %v591_v3, %v963_v4  ;;  %vm606_vm1 = vcmp.lt.s32.totalorder %v591_v3, %v964_v5 }
  0x73   : > { %vm610_vm3 = vmand %vm601_vm0, %vm606_vm1  ;;  %v592_v8 = vadd.s32 8, %v591_v3 }
  0x74   : > { %vm603_vm4 = vcmp.ge.s32.totalorder %v593_v6, %v963_v4  ;;  %vm608_vm5 = vcmp.lt.s32.totalorder %v593_v6, %v964_v5  ;;  %vm604_vm6 = vcmp.ge.s32.totalorder %v594_v7, %v963_v4  ;;  %vm609_vm7 = vcmp.lt.s32.totalorder %v594_v7, %v964_v5 }
  0x75   : > { %vm612_vm8 = vmand %vm603_vm4, %vm608_vm5  ;;  %v846_v10 = vsel %vm610_vm3, 1.0, %v1132_v9  ;;  %vm602_vm9 = vcmp.ge.s32.totalorder %v592_v8, %v963_v4  ;;  %vm607_vm10 = vcmp.lt.s32.totalorder %v592_v8, %v964_v5 }
  0x76   : > { %v848_v11 = vsel %vm612_vm8, 1.0, %v1132_v9  ;;  %vm613_vm11 = vmand %vm604_vm6, %vm609_vm7  ;;  %850 = vmatmul.msk.f32.vlgmr.msra.gmra.mxu0 %vm623_vm2, %v846_v10 }
  0x77   : > { %852 = vmatmul.msk.f32.vlgmr.msra.gmra.mxu2 %vm623_vm2, %v848_v11  ;;  %v849_v12 = vsel %vm613_vm11, 1.0, %v1132_v9  ;;  %vm611_vm12 = vmand %vm602_vm9, %vm607_vm10 }
  0x78   : > { %853 = vmatmul.msk.f32.vlgmr.msra.gmra.mxu3 %vm623_vm2, %v849_v12  ;;  %v847_v13 = vsel %vm611_vm12, 1.0, %v1132_v9 }
  0x79   : > { %851 = vmatmul.msk.f32.vlgmr.msra.gmra.mxu1 %vm623_vm2, %v847_v13 }
  0xf3   : > { %v653_v15 = vpop.f32.mrf.mxu0 }
  0xf4   : > { %v669_v16 = vadd.f32 %v665_v14, %v653_v15 }
  0xf6   : > { %673 = vst [vmem:[%s1321_s19] sm:$0xff] %v669_v16  ;;  %v656_v18 = vpop.f32.mrf.mxu1 }
  0xf7   : > { %v670_v19 = vadd.f32 %v666_v17, %v656_v18 }
  0xf9   : > { %674 = vst [vmem:[%s1321_s19 + $0x8] sm:$0xff] %v670_v19 }
  0xfa   : > { %v659_v22 = vpop.f32.mrf.mxu2 }
  0xfb   : > { %v671_v23 = vadd.f32 %v667_v20, %v659_v22  ;;  %v662_v24 = vpop.f32.mrf.mxu3 }
  0xfc   : > { %v672_v25 = vadd.f32 %v668_v21, %v662_v24 }
  0xfd   : > { %675 = vst [vmem:[%s1321_s19 + $0x10] sm:$0xff] %v671_v23 }
  0xfe   : > { %676 = vst [vmem:[%s1321_s19 + $0x18] sm:$0xff] %v672_v25 }
  0xff PF: > { %s859_s15 = sshll.u32 %s1119_s30, 5  ;;  %s692_s18 = sshll.u32 %s1321_s19, 4  ;;  %s693_s18 = int_to_ptr.vmem [resolvable:$true] %s692_s18 }
 0x100   : > { %s691_s10 = scalar_lea.hbm %s1402_s5, %s859_s15  ;;  %s678_s21 = scalar_lea.sflag [#allocation7], %s470_s25 }
 0x101   : > { %s694_s22 = sshll.u32 %s691_s10, 4  ;;  %s1039_s30 = scalar_lea.hbm %s1402_s5, 64  ;;  %s695_s22 = int_to_ptr.hbm [resolvable:$true] %s694_s22 }
 0x102   : > { %s1033_s23 = sshra.s32 %s695_s22, 4  ;;  %s1034_s23 = int_to_ptr.hbm [resolvable:$true] %s1033_s23 }
 0x103   : > { %s1035_s1 = scalar_lea.hbm %s1034_s23, 32  ;;  %p1040_p7 = scmp.lt.s32.totalorder %s1034_s23, %s1402_s5 }
 0x104   : > { %p1036_p11 = scmp.ne.s32.totalorder %s1034_s23, %s1035_s1  ;;  %p1041_p10 = scmp.lt.s32.totalorder %s1039_s30, %s1035_s1 }
 0x106   : > { %p1037_p0 = pnand %p1036_p11, %p1253_p3  ;;  %p1042_p13 = por %p1041_p10, %p1040_p7 }
 0x108   : > { %p1038_p8 = pneg %p1037_p0 }
 0x10a   : > { %p1043_p1 = pnand %p1042_p13, %p1038_p8 }
 0x10c   : > { %1046 = shalt.err (!%p1043_p1)
}
 0x10d   : > { %s1133_s25 = smov 128   ;;  %s1134_s19 = smov 8  }
 0x10e   : > { %869 = dma.vmem_to_hbm [thread:$0]  (%p1253_p3), %s693_s18, 512, %s695_s22, %s678_s21, %s1133_s25, %s1133_s25, %s1134_s19  }
 0x10f PF: > { %s709_s29 = sand.u32 1, %s1095_s26   ;;  %p880_p2 = pnand %p828_p6, %p1262_p9 }
 0x110   : > { %s710_s20 = scalar_lea.sflag [#allocation7], %s709_s29 }
 0x111   : > { %p881_p5 = pneg %p880_p2 }
 0x113   : > { %1090 = dma.done.wait (%p881_p5), %s710_s20, 512  }
 0x114   : > { %1092 = vsyncadd (%p881_p5), %s710_s20, 4294966784  ;;  %s34_s7 = sadd.s32 1, %s1127_s7   ;;  %s1417_s17 = sld [smem:[#allocation16_spill]] }
 0x115   : > { %p31_p4 = scmp.ge.s32.totalorder %s34_s7, 4   ;;  %s1418_s27 = sld [smem:[#allocation19_spill]] }
 0x116   : > { %s1419_s11 = sld [smem:[#allocation17_spill]]  ;;  %s1422_s26 = smov %s1099_s0 }
 0x117   : > { %s1420_s29 = sld [smem:[#allocation20_spill]]  ;;  %s1424_s1 = smov %s1111_s28 }
 0x118   : > { %s1421_s24 = sld [smem:[#allocation18_spill]]  ;;  %s1426_s30 = smov %s1123_s6 }
 0x11a   : > { %s1423_s0 = smov %s1417_s17  ;;  %33 = sbr.rel (!%p31_p4) target bundleno = 15 (0xf), region = 91 }
 0x11c   : > { %s1425_s28 = smov %s1419_s11 }
 0x11e   : > { %s1427_s6 = smov %s1421_s24 }
 0x11f   :  { %716 = vsyncpa [#allocation6], 1 }
 0x120   :  { %718 = vsyncpa [#allocation6 + $0x1], 1 }
 0x121   :  { %719 = vsyncpa [#allocation7], 1 }
 0x122   :  { %721 = vsyncpa [#allocation7 + $0x1], 1 }

</bundles_post_ra>
